<compile_context>
chip_gen: v7x
topology: tpu7x:2x2x1
jax: 0.10.0
libtpu: 0.0.40
codegen_flags: <defaults>
</compile_context>

<pallas_src>
import math

import jax
import jax.numpy as jnp
from jax import lax
from jax.experimental import pallas as pl
from jax.experimental.pallas import tpu as pltpu


# ----------------------------- Pallas kernel -------------------------------

def _make_bidir_lstm_kernel(seq_len, hidden_dim, unroll):
    """Kernel: one grid step per direction; full time loop inside the body."""

    T = seq_len
    H = hidden_dim

    def kernel(gx_ref, whh_ref, h0_ref, c0_ref, out_ref, hN_ref, cN_ref):
        d = pl.program_id(0)                 # 0 = forward, 1 = reverse

        whh = whh_ref[...]                   # (H, 4H) — hoisted out of the loop

        def step(s, carry):
            h_prev, c_prev = carry
            # forward processes t = s ; reverse processes t = T-1-s
            t_pos = s + d * (T - 1 - 2 * s)
            # Only the recurrent matmul remains on the serial critical path.
            gates = gx_ref[t_pos] + jnp.dot(
                h_prev, whh, preferred_element_type=jnp.float32)   # (B, 4H)
            i_g = jax.nn.sigmoid(gates[:, 0 * H:1 * H])
            f_g = jax.nn.sigmoid(gates[:, 1 * H:2 * H])
            g_g = jnp.tanh(gates[:, 2 * H:3 * H])
            o_g = jax.nn.sigmoid(gates[:, 3 * H:4 * H])
            c_new = f_g * c_prev + i_g * g_g
            h_new = o_g * jnp.tanh(c_new)
            # Write into the VMEM-resident output block; HBM writeback of the
            # whole (T, B, H) slab happens once per direction.
            out_ref[t_pos] = h_new.astype(out_ref.dtype)
            return h_new, c_new

        h_fin, c_fin = lax.fori_loop(
            0, T, step,
            (h0_ref[...].astype(jnp.float32), c0_ref[...].astype(jnp.float32)),
            unroll=unroll)

        hN_ref[...] = h_fin.astype(hN_ref.dtype)
        cN_ref[...] = c_fin.astype(cN_ref.dtype)

    return kernel


def bidir_lstm(gates_x, w_hh_t, h0, c0, *, unroll=True):
    """Bidirectional LSTM recurrence as a single pallas_call.

    gates_x: (2, T, B, 4H)  precomputed x @ W_ih^T + b_ih + b_hh per direction
    w_hh_t:  (2, H, 4H)     = W_hh^T per direction
    h0, c0:  (2, B, H)      initial states per direction
    returns: out (2, T, B, H), h_final (2, B, H), c_final (2, B, H)
    """
    D, T, B, G = gates_x.shape
    H = h0.shape[-1]
    assert D == 2 and G == 4 * H

    kernel = _make_bidir_lstm_kernel(T, H, unroll)

    out_shape = (
        jax.ShapeDtypeStruct((2, T, B, H), jnp.float32),   # per-step hidden
        jax.ShapeDtypeStruct((2, B, H), jnp.float32),      # final hidden
        jax.ShapeDtypeStruct((2, B, H), jnp.float32),      # final cell
    )
    grid_spec = pltpu.PrefetchScalarGridSpec(
        num_scalar_prefetch=0,
        grid=(2,),                                         # direction axis
        in_specs=[
            pl.BlockSpec((None, T, B, 4 * H), lambda d: (d, 0, 0, 0)),  # gates_x
            pl.BlockSpec((None, H, 4 * H), lambda d: (d, 0, 0)),        # W_hh^T
            pl.BlockSpec((None, B, H), lambda d: (d, 0, 0)),            # h0
            pl.BlockSpec((None, B, H), lambda d: (d, 0, 0)),            # c0
        ],
        out_specs=[
            pl.BlockSpec((None, T, B, H), lambda d: (d, 0, 0, 0)),      # out
            pl.BlockSpec((None, B, H), lambda d: (d, 0, 0)),            # hN
            pl.BlockSpec((None, B, H), lambda d: (d, 0, 0)),            # cN
        ],
    )
    return pl.pallas_call(
        kernel,
        out_shape=out_shape,
        grid_spec=grid_spec,
        compiler_params=pltpu.CompilerParams(
            # Directions are independent -> megacore-shardable on v7x.
            dimension_semantics=("parallel",)),
    )(gates_x, w_hh_t, h0, c0)


# ----------------------------- Encoder module ------------------------------

def init_encoder_params(key, voc_size, hidden_dim):
    """Deterministic parameter init mirroring PyTorch shapes (stacked by dir)."""
    ks = jax.random.split(key, 9)
    bound = 1.0 / math.sqrt(hidden_dim)

    def u(k, shape):
        return jax.random.uniform(k, shape, jnp.float32, -bound, bound)

    # PyTorch stores weight_ih_l0 as (4H, H); we keep the transposed (H, 4H).
    w_ih_f = u(ks[1], (4 * hidden_dim, hidden_dim)).T
    w_hh_f = u(ks[2], (4 * hidden_dim, hidden_dim)).T
    b_f = u(ks[3], (4 * hidden_dim,)) + u(ks[4], (4 * hidden_dim,))
    w_ih_b = u(ks[5], (4 * hidden_dim, hidden_dim)).T
    w_hh_b = u(ks[6], (4 * hidden_dim, hidden_dim)).T
    b_b = u(ks[7], (4 * hidden_dim,)) + u(ks[8], (4 * hidden_dim,))

    return {
        # nn.Embedding default init: N(0, 1)
        "embedding": jax.random.normal(ks[0], (voc_size, hidden_dim), jnp.float32),
        "w_ih": jnp.stack([w_ih_f, w_ih_b], axis=0),   # (2, H, 4H)
        "w_hh": jnp.stack([w_hh_f, w_hh_b], axis=0),   # (2, H, 4H)
        "bias": jnp.stack([b_f, b_b], axis=0),         # (2, 4H) = b_ih + b_hh
    }


def encoder_init_hidden(num_layer, batch_size, hidden_dim):
    return (jnp.zeros((2 * num_layer, batch_size, hidden_dim), jnp.float32),
            jnp.zeros((2 * num_layer, batch_size, hidden_dim), jnp.float32))


def encoder_forward(params, input_ids, state):
    """input_ids: (B, T) int32;  state: (h0, c0) each (2, B, H).

    Returns: output (B, T, 2H), (hidden (2, B, H), cell (2, B, H)).
    """
    h0, c0 = state

    # Embedding gather directly into time-major (T, B, H) — no transpose copy.
    x = jnp.take(params["embedding"], input_ids.T, axis=0)            # (T, B, H)

    # Hoisted input projection: one big matmul for all T and both directions,
    # with the (b_ih + b_hh) bias folded in.
    gates_x = (jnp.einsum("tbh,dhg->dtbg", x, params["w_ih"])
               + params["bias"][:, None, None, :]).astype(jnp.float32)  # (2,T,B,4H)

    out, hidden, cell = bidir_lstm(gates_x, params["w_hh"], h0, c0)

    # (2, T, B, H) -> (B, T, 2H), batch_first with [forward | backward] concat.
    output = jnp.concatenate([out[0], out[1]], axis=-1)                # (T, B, 2H)
    output = jnp.transpose(output, (1, 0, 2))                           # (B, T, 2H)
    return output, (hidden, cell)


# --------------------------- pure-JAX reference -----------------------------

def _encoder_forward_ref(params, input_ids, state):
    """Reference (lax.scan) bidirectional LSTM for correctness checking."""
    h0, c0 = state
    emb = jnp.take(params["embedding"], input_ids, axis=0)    # (B, T, H)
    x = jnp.transpose(emb, (1, 0, 2))                          # (T, B, H)

    def run(direction, reverse):
        w_ih = params["w_ih"][direction]
        w_hh = params["w_hh"][direction]
        b = params["bias"][direction]

        def step(carry, x_t):
            h, c = carry
            g = x_t @ w_ih + h @ w_hh + b
            H = h.shape[-1]
            i = jax.nn.sigmoid(g[:, 0 * H:1 * H])
            f = jax.nn.sigmoid(g[:, 1 * H:2 * H])
            gg = jnp.tanh(g[:, 2 * H:3 * H])
            o = jax.nn.sigmoid(g[:, 3 * H:4 * H])
            c = f * c + i * gg
            h = o * jnp.tanh(c)
            return (h, c), h

        xs = x[::-1] if reverse else x
        (hN, cN), hs = lax.scan(step, (h0[direction], c0[direction]), xs)
        hs = hs[::-1] if reverse else hs
        return hs, hN, cN

    out_f, hN_f, cN_f = run(0, False)
    out_b, hN_b, cN_b = run(1, True)
    output = jnp.transpose(jnp.concatenate([out_f, out_b], axis=-1), (1, 0, 2))
    return output, (jnp.stack([hN_f, hN_b]), jnp.stack([cN_f, cN_b]))


# ----------------------------------- main -----------------------------------

if __name__ == "__main__":
    voc_size = 50
    hidden_dim = 32
    batch_size = 2
    seq_len = 8
    num_layer = 1

    key = jax.random.PRNGKey(0)
    k_params, k_ids = jax.random.split(key)

    params = init_encoder_params(k_params, voc_size, hidden_dim)
    input_ids = jax.random.randint(k_ids, (batch_size, seq_len), 0, voc_size,
                                   dtype=jnp.int32)
    state = encoder_init_hidden(num_layer, batch_size, hidden_dim)

    fwd = jax.jit(encoder_forward)
    output, (hidden, cell) = fwd(params, input_ids, state)
    jax.block_until_ready((output, hidden, cell))

    assert output.shape == (batch_size, seq_len, 2 * hidden_dim)
    assert hidden.shape == (2 * num_layer, batch_size, hidden_dim)
    assert cell.shape == (2 * num_layer, batch_size, hidden_dim)

    # Cross-check against a pure-JAX reference (loose tolerance: TPU default
    # f32 matmul precision differs slightly between XLA glue and the kernel).
    ref_out, (ref_h, ref_c) = _encoder_forward_ref(params, input_ids, state)
    assert jnp.allclose(output, ref_out, rtol=2e-2, atol=2e-2)
    assert jnp.allclose(hidden, ref_h, rtol=2e-2, atol=2e-2)
    assert jnp.allclose(cell, ref_c, rtol=2e-2, atol=2e-2)

    print("KERNEL_OK")
</pallas_src>

<mosaic_0001>
module attributes {stable_mosaic.version = 11 : i64} {
  func.func @kernel(%arg0: i32, %arg1: memref<1x8x2x128xf32, #tpu.memory_space<vmem>>, %arg2: memref<1x32x128xf32, #tpu.memory_space<vmem>>, %arg3: memref<1x2x32xf32, #tpu.memory_space<vmem>>, %arg4: memref<1x2x32xf32, #tpu.memory_space<vmem>>, %arg5: memref<1x8x2x32xf32, #tpu.memory_space<vmem>>, %arg6: memref<1x2x32xf32, #tpu.memory_space<vmem>>, %arg7: memref<1x2x32xf32, #tpu.memory_space<vmem>>) attributes {dimension_semantics = [#tpu.dimension_semantics<parallel>], iteration_bounds = array<i64: 2>, scalar_prefetch = 0 : i64, scratch_operands = 0 : i64, tpu.core_type = #tpu.core_type<tc>, window_params = [{transform_indices = @transform_0, window_bounds = array<i64: 1, 8, 2, 128>}, {transform_indices = @transform_1, window_bounds = array<i64: 1, 32, 128>}, {transform_indices = @transform_2, window_bounds = array<i64: 1, 2, 32>}, {transform_indices = @transform_3, window_bounds = array<i64: 1, 2, 32>}, {transform_indices = @transform_4, window_bounds = array<i64: 1, 8, 2, 32>}, {transform_indices = @transform_5, window_bounds = array<i64: 1, 2, 32>}, {transform_indices = @transform_6, window_bounds = array<i64: 1, 2, 32>}]} {
    %c0 = arith.constant 0 : index
    %c0_0 = arith.constant 0 : index
    %c0_1 = arith.constant 0 : index
    %0 = vector.load %arg2[%c0, %c0_0, %c0_1] : memref<1x32x128xf32, #tpu.memory_space<vmem>>, vector<1x32x128xf32>
    %1 = vector.shape_cast %0 : vector<1x32x128xf32> to vector<32x128xf32>
    %c0_2 = arith.constant 0 : index
    %c0_3 = arith.constant 0 : index
    %c0_4 = arith.constant 0 : index
    %2 = vector.load %arg3[%c0_2, %c0_3, %c0_4] : memref<1x2x32xf32, #tpu.memory_space<vmem>>, vector<1x2x32xf32>
    %3 = vector.shape_cast %2 : vector<1x2x32xf32> to vector<2x32xf32>
    %c0_5 = arith.constant 0 : index
    %c0_6 = arith.constant 0 : index
    %c0_7 = arith.constant 0 : index
    %4 = vector.load %arg4[%c0_5, %c0_6, %c0_7] : memref<1x2x32xf32, #tpu.memory_space<vmem>>, vector<1x2x32xf32>
    %5 = vector.shape_cast %4 : vector<1x2x32xf32> to vector<2x32xf32>
    %c0_i32 = arith.constant 0 : i32
    %c2_i32 = arith.constant 2 : i32
    %6 = arith.muli %c2_i32, %c0_i32 : i32
    %c7_i32 = arith.constant 7 : i32
    %7 = arith.subi %c7_i32, %6 : i32
    %8 = arith.muli %arg0, %7 : i32
    %9 = arith.addi %c0_i32, %8 : i32
    %c0_8 = arith.constant 0 : index
    %10 = arith.index_cast %9 : i32 to index
    %c0_9 = arith.constant 0 : index
    %c0_10 = arith.constant 0 : index
    %11 = vector.load %arg1[%c0_8, %10, %c0_9, %c0_10] : memref<1x8x2x128xf32, #tpu.memory_space<vmem>>, vector<1x1x2x128xf32>
    %12 = vector.shape_cast %11 : vector<1x1x2x128xf32> to vector<2x128xf32>
    %cst = arith.constant dense<0.000000e+00> : vector<2x128xf32>
    %13 = tpu.matmul %3, %1, %cst {dimension_numbers = #tpu.dot_dimension_numbers<[1], [0], [0], [1], [0, 0, 1, 1], [], []>} : vector<2x32xf32>, vector<32x128xf32>, vector<2x128xf32> -> vector<2x128xf32>
    %14 = arith.addf %12, %13 : vector<2x128xf32>
    %15 = vector.extract_strided_slice %14 {offsets = [0, 0], sizes = [2, 32], strides = [1, 1]} : vector<2x128xf32> to vector<2x32xf32>
    %16 = arith.negf %15 : vector<2x32xf32>
    %17 = math.exp %16 : vector<2x32xf32>
    %cst_11 = arith.constant 1.000000e+00 : f32
    %18 = vector.broadcast %cst_11 : f32 to vector<2x32xf32>
    %19 = arith.addf %18, %17 : vector<2x32xf32>
    %20 = arith.divf %18, %19 : vector<2x32xf32>
    %21 = vector.extract_strided_slice %14 {offsets = [0, 32], sizes = [2, 32], strides = [1, 1]} : vector<2x128xf32> to vector<2x32xf32>
    %22 = arith.negf %21 : vector<2x32xf32>
    %23 = math.exp %22 : vector<2x32xf32>
    %cst_12 = arith.constant 1.000000e+00 : f32
    %24 = vector.broadcast %cst_12 : f32 to vector<2x32xf32>
    %25 = arith.addf %24, %23 : vector<2x32xf32>
    %26 = arith.divf %24, %25 : vector<2x32xf32>
    %27 = vector.extract_strided_slice %14 {offsets = [0, 64], sizes = [2, 32], strides = [1, 1]} : vector<2x128xf32> to vector<2x32xf32>
    %28 = math.tanh %27 : vector<2x32xf32>
    %29 = vector.extract_strided_slice %14 {offsets = [0, 96], sizes = [2, 32], strides = [1, 1]} : vector<2x128xf32> to vector<2x32xf32>
    %30 = arith.negf %29 : vector<2x32xf32>
    %31 = math.exp %30 : vector<2x32xf32>
    %cst_13 = arith.constant 1.000000e+00 : f32
    %32 = vector.broadcast %cst_13 : f32 to vector<2x32xf32>
    %33 = arith.addf %32, %31 : vector<2x32xf32>
    %34 = arith.divf %32, %33 : vector<2x32xf32>
    %35 = arith.mulf %26, %5 : vector<2x32xf32>
    %36 = arith.mulf %20, %28 : vector<2x32xf32>
    %37 = arith.addf %35, %36 : vector<2x32xf32>
    %38 = math.tanh %37 : vector<2x32xf32>
    %39 = arith.mulf %34, %38 : vector<2x32xf32>
    %c0_14 = arith.constant 0 : index
    %40 = arith.index_cast %9 : i32 to index
    %c0_15 = arith.constant 0 : index
    %c0_16 = arith.constant 0 : index
    %41 = vector.load %arg5[%c0_14, %40, %c0_15, %c0_16] : memref<1x8x2x32xf32, #tpu.memory_space<vmem>>, vector<1x1x2x32xf32>
    %42 = vector.shape_cast %41 : vector<1x1x2x32xf32> to vector<2x32xf32>
    %43 = vector.shape_cast %39 : vector<2x32xf32> to vector<1x1x2x32xf32>
    tpu.vector_store %arg5[%c0_14, %40, %c0_15, %c0_16], %43 {strides = array<i32>} : memref<1x8x2x32xf32, #tpu.memory_space<vmem>>, vector<1x1x2x32xf32>,
    %c1_i32 = arith.constant 1 : i32
    %c2_i32_17 = arith.constant 2 : i32
    %44 = arith.muli %c2_i32_17, %c1_i32 : i32
    %c7_i32_18 = arith.constant 7 : i32
    %45 = arith.subi %c7_i32_18, %44 : i32
    %46 = arith.muli %arg0, %45 : i32
    %47 = arith.addi %c1_i32, %46 : i32
    %c0_19 = arith.constant 0 : index
    %48 = arith.index_cast %47 : i32 to index
    %c0_20 = arith.constant 0 : index
    %c0_21 = arith.constant 0 : index
    %49 = vector.load %arg1[%c0_19, %48, %c0_20, %c0_21] : memref<1x8x2x128xf32, #tpu.memory_space<vmem>>, vector<1x1x2x128xf32>
    %50 = vector.shape_cast %49 : vector<1x1x2x128xf32> to vector<2x128xf32>
    %cst_22 = arith.constant dense<0.000000e+00> : vector<2x128xf32>
    %51 = tpu.matmul %39, %1, %cst_22 {dimension_numbers = #tpu.dot_dimension_numbers<[1], [0], [0], [1], [0, 0, 1, 1], [], []>} : vector<2x32xf32>, vector<32x128xf32>, vector<2x128xf32> -> vector<2x128xf32>
    %52 = arith.addf %50, %51 : vector<2x128xf32>
    %53 = vector.extract_strided_slice %52 {offsets = [0, 0], sizes = [2, 32], strides = [1, 1]} : vector<2x128xf32> to vector<2x32xf32>
    %54 = arith.negf %53 : vector<2x32xf32>
    %55 = math.exp %54 : vector<2x32xf32>
    %cst_23 = arith.constant 1.000000e+00 : f32
    %56 = vector.broadcast %cst_23 : f32 to vector<2x32xf32>
    %57 = arith.addf %56, %55 : vector<2x32xf32>
    %58 = arith.divf %56, %57 : vector<2x32xf32>
    %59 = vector.extract_strided_slice %52 {offsets = [0, 32], sizes = [2, 32], strides = [1, 1]} : vector<2x128xf32> to vector<2x32xf32>
    %60 = arith.negf %59 : vector<2x32xf32>
    %61 = math.exp %60 : vector<2x32xf32>
    %cst_24 = arith.constant 1.000000e+00 : f32
    %62 = vector.broadcast %cst_24 : f32 to vector<2x32xf32>
    %63 = arith.addf %62, %61 : vector<2x32xf32>
    %64 = arith.divf %62, %63 : vector<2x32xf32>
    %65 = vector.extract_strided_slice %52 {offsets = [0, 64], sizes = [2, 32], strides = [1, 1]} : vector<2x128xf32> to vector<2x32xf32>
    %66 = math.tanh %65 : vector<2x32xf32>
    %67 = vector.extract_strided_slice %52 {offsets = [0, 96], sizes = [2, 32], strides = [1, 1]} : vector<2x128xf32> to vector<2x32xf32>
    %68 = arith.negf %67 : vector<2x32xf32>
    %69 = math.exp %68 : vector<2x32xf32>
    %cst_25 = arith.constant 1.000000e+00 : f32
    %70 = vector.broadcast %cst_25 : f32 to vector<2x32xf32>
    %71 = arith.addf %70, %69 : vector<2x32xf32>
    %72 = arith.divf %70, %71 : vector<2x32xf32>
    %73 = arith.mulf %64, %37 : vector<2x32xf32>
    %74 = arith.mulf %58, %66 : vector<2x32xf32>
    %75 = arith.addf %73, %74 : vector<2x32xf32>
    %76 = math.tanh %75 : vector<2x32xf32>
    %77 = arith.mulf %72, %76 : vector<2x32xf32>
    %c0_26 = arith.constant 0 : index
    %78 = arith.index_cast %47 : i32 to index
    %c0_27 = arith.constant 0 : index
    %c0_28 = arith.constant 0 : index
    %79 = vector.load %arg5[%c0_26, %78, %c0_27, %c0_28] : memref<1x8x2x32xf32, #tpu.memory_space<vmem>>, vector<1x1x2x32xf32>
    %80 = vector.shape_cast %79 : vector<1x1x2x32xf32> to vector<2x32xf32>
    %81 = vector.shape_cast %77 : vector<2x32xf32> to vector<1x1x2x32xf32>
    tpu.vector_store %arg5[%c0_26, %78, %c0_27, %c0_28], %81 {strides = array<i32>} : memref<1x8x2x32xf32, #tpu.memory_space<vmem>>, vector<1x1x2x32xf32>,
    %c2_i32_29 = arith.constant 2 : i32
    %c2_i32_30 = arith.constant 2 : i32
    %82 = arith.muli %c2_i32_30, %c2_i32_29 : i32
    %c7_i32_31 = arith.constant 7 : i32
    %83 = arith.subi %c7_i32_31, %82 : i32
    %84 = arith.muli %arg0, %83 : i32
    %85 = arith.addi %c2_i32_29, %84 : i32
    %c0_32 = arith.constant 0 : index
    %86 = arith.index_cast %85 : i32 to index
    %c0_33 = arith.constant 0 : index
    %c0_34 = arith.constant 0 : index
    %87 = vector.load %arg1[%c0_32, %86, %c0_33, %c0_34] : memref<1x8x2x128xf32, #tpu.memory_space<vmem>>, vector<1x1x2x128xf32>
    %88 = vector.shape_cast %87 : vector<1x1x2x128xf32> to vector<2x128xf32>
    %cst_35 = arith.constant dense<0.000000e+00> : vector<2x128xf32>
    %89 = tpu.matmul %77, %1, %cst_35 {dimension_numbers = #tpu.dot_dimension_numbers<[1], [0], [0], [1], [0, 0, 1, 1], [], []>} : vector<2x32xf32>, vector<32x128xf32>, vector<2x128xf32> -> vector<2x128xf32>
    %90 = arith.addf %88, %89 : vector<2x128xf32>
    %91 = vector.extract_strided_slice %90 {offsets = [0, 0], sizes = [2, 32], strides = [1, 1]} : vector<2x128xf32> to vector<2x32xf32>
    %92 = arith.negf %91 : vector<2x32xf32>
    %93 = math.exp %92 : vector<2x32xf32>
    %cst_36 = arith.constant 1.000000e+00 : f32
    %94 = vector.broadcast %cst_36 : f32 to vector<2x32xf32>
    %95 = arith.addf %94, %93 : vector<2x32xf32>
    %96 = arith.divf %94, %95 : vector<2x32xf32>
    %97 = vector.extract_strided_slice %90 {offsets = [0, 32], sizes = [2, 32], strides = [1, 1]} : vector<2x128xf32> to vector<2x32xf32>
    %98 = arith.negf %97 : vector<2x32xf32>
    %99 = math.exp %98 : vector<2x32xf32>
    %cst_37 = arith.constant 1.000000e+00 : f32
    %100 = vector.broadcast %cst_37 : f32 to vector<2x32xf32>
    %101 = arith.addf %100, %99 : vector<2x32xf32>
    %102 = arith.divf %100, %101 : vector<2x32xf32>
    %103 = vector.extract_strided_slice %90 {offsets = [0, 64], sizes = [2, 32], strides = [1, 1]} : vector<2x128xf32> to vector<2x32xf32>
    %104 = math.tanh %103 : vector<2x32xf32>
    %105 = vector.extract_strided_slice %90 {offsets = [0, 96], sizes = [2, 32], strides = [1, 1]} : vector<2x128xf32> to vector<2x32xf32>
    %106 = arith.negf %105 : vector<2x32xf32>
    %107 = math.exp %106 : vector<2x32xf32>
    %cst_38 = arith.constant 1.000000e+00 : f32
    %108 = vector.broadcast %cst_38 : f32 to vector<2x32xf32>
    %109 = arith.addf %108, %107 : vector<2x32xf32>
    %110 = arith.divf %108, %109 : vector<2x32xf32>
    %111 = arith.mulf %102, %75 : vector<2x32xf32>
    %112 = arith.mulf %96, %104 : vector<2x32xf32>
    %113 = arith.addf %111, %112 : vector<2x32xf32>
    %114 = math.tanh %113 : vector<2x32xf32>
    %115 = arith.mulf %110, %114 : vector<2x32xf32>
    %c0_39 = arith.constant 0 : index
    %116 = arith.index_cast %85 : i32 to index
    %c0_40 = arith.constant 0 : index
    %c0_41 = arith.constant 0 : index
    %117 = vector.load %arg5[%c0_39, %116, %c0_40, %c0_41] : memref<1x8x2x32xf32, #tpu.memory_space<vmem>>, vector<1x1x2x32xf32>
    %118 = vector.shape_cast %117 : vector<1x1x2x32xf32> to vector<2x32xf32>
    %119 = vector.shape_cast %115 : vector<2x32xf32> to vector<1x1x2x32xf32>
    tpu.vector_store %arg5[%c0_39, %116, %c0_40, %c0_41], %119 {strides = array<i32>} : memref<1x8x2x32xf32, #tpu.memory_space<vmem>>, vector<1x1x2x32xf32>,
    %c3_i32 = arith.constant 3 : i32
    %c2_i32_42 = arith.constant 2 : i32
    %120 = arith.muli %c2_i32_42, %c3_i32 : i32
    %c7_i32_43 = arith.constant 7 : i32
    %121 = arith.subi %c7_i32_43, %120 : i32
    %122 = arith.muli %arg0, %121 : i32
    %123 = arith.addi %c3_i32, %122 : i32
    %c0_44 = arith.constant 0 : index
    %124 = arith.index_cast %123 : i32 to index
    %c0_45 = arith.constant 0 : index
    %c0_46 = arith.constant 0 : index
    %125 = vector.load %arg1[%c0_44, %124, %c0_45, %c0_46] : memref<1x8x2x128xf32, #tpu.memory_space<vmem>>, vector<1x1x2x128xf32>
    %126 = vector.shape_cast %125 : vector<1x1x2x128xf32> to vector<2x128xf32>
    %cst_47 = arith.constant dense<0.000000e+00> : vector<2x128xf32>
    %127 = tpu.matmul %115, %1, %cst_47 {dimension_numbers = #tpu.dot_dimension_numbers<[1], [0], [0], [1], [0, 0, 1, 1], [], []>} : vector<2x32xf32>, vector<32x128xf32>, vector<2x128xf32> -> vector<2x128xf32>
    %128 = arith.addf %126, %127 : vector<2x128xf32>
    %129 = vector.extract_strided_slice %128 {offsets = [0, 0], sizes = [2, 32], strides = [1, 1]} : vector<2x128xf32> to vector<2x32xf32>
    %130 = arith.negf %129 : vector<2x32xf32>
    %131 = math.exp %130 : vector<2x32xf32>
    %cst_48 = arith.constant 1.000000e+00 : f32
    %132 = vector.broadcast %cst_48 : f32 to vector<2x32xf32>
    %133 = arith.addf %132, %131 : vector<2x32xf32>
    %134 = arith.divf %132, %133 : vector<2x32xf32>
    %135 = vector.extract_strided_slice %128 {offsets = [0, 32], sizes = [2, 32], strides = [1, 1]} : vector<2x128xf32> to vector<2x32xf32>
    %136 = arith.negf %135 : vector<2x32xf32>
    %137 = math.exp %136 : vector<2x32xf32>
    %cst_49 = arith.constant 1.000000e+00 : f32
    %138 = vector.broadcast %cst_49 : f32 to vector<2x32xf32>
    %139 = arith.addf %138, %137 : vector<2x32xf32>
    %140 = arith.divf %138, %139 : vector<2x32xf32>
    %141 = vector.extract_strided_slice %128 {offsets = [0, 64], sizes = [2, 32], strides = [1, 1]} : vector<2x128xf32> to vector<2x32xf32>
    %142 = math.tanh %141 : vector<2x32xf32>
    %143 = vector.extract_strided_slice %128 {offsets = [0, 96], sizes = [2, 32], strides = [1, 1]} : vector<2x128xf32> to vector<2x32xf32>
    %144 = arith.negf %143 : vector<2x32xf32>
    %145 = math.exp %144 : vector<2x32xf32>
    %cst_50 = arith.constant 1.000000e+00 : f32
    %146 = vector.broadcast %cst_50 : f32 to vector<2x32xf32>
    %147 = arith.addf %146, %145 : vector<2x32xf32>
    %148 = arith.divf %146, %147 : vector<2x32xf32>
    %149 = arith.mulf %140, %113 : vector<2x32xf32>
    %150 = arith.mulf %134, %142 : vector<2x32xf32>
    %151 = arith.addf %149, %150 : vector<2x32xf32>
    %152 = math.tanh %151 : vector<2x32xf32>
    %153 = arith.mulf %148, %152 : vector<2x32xf32>
    %c0_51 = arith.constant 0 : index
    %154 = arith.index_cast %123 : i32 to index
    %c0_52 = arith.constant 0 : index
    %c0_53 = arith.constant 0 : index
    %155 = vector.load %arg5[%c0_51, %154, %c0_52, %c0_53] : memref<1x8x2x32xf32, #tpu.memory_space<vmem>>, vector<1x1x2x32xf32>
    %156 = vector.shape_cast %155 : vector<1x1x2x32xf32> to vector<2x32xf32>
    %157 = vector.shape_cast %153 : vector<2x32xf32> to vector<1x1x2x32xf32>
    tpu.vector_store %arg5[%c0_51, %154, %c0_52, %c0_53], %157 {strides = array<i32>} : memref<1x8x2x32xf32, #tpu.memory_space<vmem>>, vector<1x1x2x32xf32>,
    %c4_i32 = arith.constant 4 : i32
    %c2_i32_54 = arith.constant 2 : i32
    %158 = arith.muli %c2_i32_54, %c4_i32 : i32
    %c7_i32_55 = arith.constant 7 : i32
    %159 = arith.subi %c7_i32_55, %158 : i32
    %160 = arith.muli %arg0, %159 : i32
    %161 = arith.addi %c4_i32, %160 : i32
    %c0_56 = arith.constant 0 : index
    %162 = arith.index_cast %161 : i32 to index
    %c0_57 = arith.constant 0 : index
    %c0_58 = arith.constant 0 : index
    %163 = vector.load %arg1[%c0_56, %162, %c0_57, %c0_58] : memref<1x8x2x128xf32, #tpu.memory_space<vmem>>, vector<1x1x2x128xf32>
    %164 = vector.shape_cast %163 : vector<1x1x2x128xf32> to vector<2x128xf32>
    %cst_59 = arith.constant dense<0.000000e+00> : vector<2x128xf32>
    %165 = tpu.matmul %153, %1, %cst_59 {dimension_numbers = #tpu.dot_dimension_numbers<[1], [0], [0], [1], [0, 0, 1, 1], [], []>} : vector<2x32xf32>, vector<32x128xf32>, vector<2x128xf32> -> vector<2x128xf32>
    %166 = arith.addf %164, %165 : vector<2x128xf32>
    %167 = vector.extract_strided_slice %166 {offsets = [0, 0], sizes = [2, 32], strides = [1, 1]} : vector<2x128xf32> to vector<2x32xf32>
    %168 = arith.negf %167 : vector<2x32xf32>
    %169 = math.exp %168 : vector<2x32xf32>
    %cst_60 = arith.constant 1.000000e+00 : f32
    %170 = vector.broadcast %cst_60 : f32 to vector<2x32xf32>
    %171 = arith.addf %170, %169 : vector<2x32xf32>
    %172 = arith.divf %170, %171 : vector<2x32xf32>
    %173 = vector.extract_strided_slice %166 {offsets = [0, 32], sizes = [2, 32], strides = [1, 1]} : vector<2x128xf32> to vector<2x32xf32>
    %174 = arith.negf %173 : vector<2x32xf32>
    %175 = math.exp %174 : vector<2x32xf32>
    %cst_61 = arith.constant 1.000000e+00 : f32
    %176 = vector.broadcast %cst_61 : f32 to vector<2x32xf32>
    %177 = arith.addf %176, %175 : vector<2x32xf32>
    %178 = arith.divf %176, %177 : vector<2x32xf32>
    %179 = vector.extract_strided_slice %166 {offsets = [0, 64], sizes = [2, 32], strides = [1, 1]} : vector<2x128xf32> to vector<2x32xf32>
    %180 = math.tanh %179 : vector<2x32xf32>
    %181 = vector.extract_strided_slice %166 {offsets = [0, 96], sizes = [2, 32], strides = [1, 1]} : vector<2x128xf32> to vector<2x32xf32>
    %182 = arith.negf %181 : vector<2x32xf32>
    %183 = math.exp %182 : vector<2x32xf32>
    %cst_62 = arith.constant 1.000000e+00 : f32
    %184 = vector.broadcast %cst_62 : f32 to vector<2x32xf32>
    %185 = arith.addf %184, %183 : vector<2x32xf32>
    %186 = arith.divf %184, %185 : vector<2x32xf32>
    %187 = arith.mulf %178, %151 : vector<2x32xf32>
    %188 = arith.mulf %172, %180 : vector<2x32xf32>
    %189 = arith.addf %187, %188 : vector<2x32xf32>
    %190 = math.tanh %189 : vector<2x32xf32>
    %191 = arith.mulf %186, %190 : vector<2x32xf32>
    %c0_63 = arith.constant 0 : index
    %192 = arith.index_cast %161 : i32 to index
    %c0_64 = arith.constant 0 : index
    %c0_65 = arith.constant 0 : index
    %193 = vector.load %arg5[%c0_63, %192, %c0_64, %c0_65] : memref<1x8x2x32xf32, #tpu.memory_space<vmem>>, vector<1x1x2x32xf32>
    %194 = vector.shape_cast %193 : vector<1x1x2x32xf32> to vector<2x32xf32>
    %195 = vector.shape_cast %191 : vector<2x32xf32> to vector<1x1x2x32xf32>
    tpu.vector_store %arg5[%c0_63, %192, %c0_64, %c0_65], %195 {strides = array<i32>} : memref<1x8x2x32xf32, #tpu.memory_space<vmem>>, vector<1x1x2x32xf32>,
    %c5_i32 = arith.constant 5 : i32
    %c2_i32_66 = arith.constant 2 : i32
    %196 = arith.muli %c2_i32_66, %c5_i32 : i32
    %c7_i32_67 = arith.constant 7 : i32
    %197 = arith.subi %c7_i32_67, %196 : i32
    %198 = arith.muli %arg0, %197 : i32
    %199 = arith.addi %c5_i32, %198 : i32
    %c0_68 = arith.constant 0 : index
    %200 = arith.index_cast %199 : i32 to index
    %c0_69 = arith.constant 0 : index
    %c0_70 = arith.constant 0 : index
    %201 = vector.load %arg1[%c0_68, %200, %c0_69, %c0_70] : memref<1x8x2x128xf32, #tpu.memory_space<vmem>>, vector<1x1x2x128xf32>
    %202 = vector.shape_cast %201 : vector<1x1x2x128xf32> to vector<2x128xf32>
    %cst_71 = arith.constant dense<0.000000e+00> : vector<2x128xf32>
    %203 = tpu.matmul %191, %1, %cst_71 {dimension_numbers = #tpu.dot_dimension_numbers<[1], [0], [0], [1], [0, 0, 1, 1], [], []>} : vector<2x32xf32>, vector<32x128xf32>, vector<2x128xf32> -> vector<2x128xf32>
    %204 = arith.addf %202, %203 : vector<2x128xf32>
    %205 = vector.extract_strided_slice %204 {offsets = [0, 0], sizes = [2, 32], strides = [1, 1]} : vector<2x128xf32> to vector<2x32xf32>
    %206 = arith.negf %205 : vector<2x32xf32>
    %207 = math.exp %206 : vector<2x32xf32>
    %cst_72 = arith.constant 1.000000e+00 : f32
    %208 = vector.broadcast %cst_72 : f32 to vector<2x32xf32>
    %209 = arith.addf %208, %207 : vector<2x32xf32>
    %210 = arith.divf %208, %209 : vector<2x32xf32>
    %211 = vector.extract_strided_slice %204 {offsets = [0, 32], sizes = [2, 32], strides = [1, 1]} : vector<2x128xf32> to vector<2x32xf32>
    %212 = arith.negf %211 : vector<2x32xf32>
    %213 = math.exp %212 : vector<2x32xf32>
    %cst_73 = arith.constant 1.000000e+00 : f32
    %214 = vector.broadcast %cst_73 : f32 to vector<2x32xf32>
    %215 = arith.addf %214, %213 : vector<2x32xf32>
    %216 = arith.divf %214, %215 : vector<2x32xf32>
    %217 = vector.extract_strided_slice %204 {offsets = [0, 64], sizes = [2, 32], strides = [1, 1]} : vector<2x128xf32> to vector<2x32xf32>
    %218 = math.tanh %217 : vector<2x32xf32>
    %219 = vector.extract_strided_slice %204 {offsets = [0, 96], sizes = [2, 32], strides = [1, 1]} : vector<2x128xf32> to vector<2x32xf32>
    %220 = arith.negf %219 : vector<2x32xf32>
    %221 = math.exp %220 : vector<2x32xf32>
    %cst_74 = arith.constant 1.000000e+00 : f32
    %222 = vector.broadcast %cst_74 : f32 to vector<2x32xf32>
    %223 = arith.addf %222, %221 : vector<2x32xf32>
    %224 = arith.divf %222, %223 : vector<2x32xf32>
    %225 = arith.mulf %216, %189 : vector<2x32xf32>
    %226 = arith.mulf %210, %218 : vector<2x32xf32>
    %227 = arith.addf %225, %226 : vector<2x32xf32>
    %228 = math.tanh %227 : vector<2x32xf32>
    %229 = arith.mulf %224, %228 : vector<2x32xf32>
    %c0_75 = arith.constant 0 : index
    %230 = arith.index_cast %199 : i32 to index
    %c0_76 = arith.constant 0 : index
    %c0_77 = arith.constant 0 : index
    %231 = vector.load %arg5[%c0_75, %230, %c0_76, %c0_77] : memref<1x8x2x32xf32, #tpu.memory_space<vmem>>, vector<1x1x2x32xf32>
    %232 = vector.shape_cast %231 : vector<1x1x2x32xf32> to vector<2x32xf32>
    %233 = vector.shape_cast %229 : vector<2x32xf32> to vector<1x1x2x32xf32>
    tpu.vector_store %arg5[%c0_75, %230, %c0_76, %c0_77], %233 {strides = array<i32>} : memref<1x8x2x32xf32, #tpu.memory_space<vmem>>, vector<1x1x2x32xf32>,
    %c6_i32 = arith.constant 6 : i32
    %c2_i32_78 = arith.constant 2 : i32
    %234 = arith.muli %c2_i32_78, %c6_i32 : i32
    %c7_i32_79 = arith.constant 7 : i32
    %235 = arith.subi %c7_i32_79, %234 : i32
    %236 = arith.muli %arg0, %235 : i32
    %237 = arith.addi %c6_i32, %236 : i32
    %c0_80 = arith.constant 0 : index
    %238 = arith.index_cast %237 : i32 to index
    %c0_81 = arith.constant 0 : index
    %c0_82 = arith.constant 0 : index
    %239 = vector.load %arg1[%c0_80, %238, %c0_81, %c0_82] : memref<1x8x2x128xf32, #tpu.memory_space<vmem>>, vector<1x1x2x128xf32>
    %240 = vector.shape_cast %239 : vector<1x1x2x128xf32> to vector<2x128xf32>
    %cst_83 = arith.constant dense<0.000000e+00> : vector<2x128xf32>
    %241 = tpu.matmul %229, %1, %cst_83 {dimension_numbers = #tpu.dot_dimension_numbers<[1], [0], [0], [1], [0, 0, 1, 1], [], []>} : vector<2x32xf32>, vector<32x128xf32>, vector<2x128xf32> -> vector<2x128xf32>
    %242 = arith.addf %240, %241 : vector<2x128xf32>
    %243 = vector.extract_strided_slice %242 {offsets = [0, 0], sizes = [2, 32], strides = [1, 1]} : vector<2x128xf32> to vector<2x32xf32>
    %244 = arith.negf %243 : vector<2x32xf32>
    %245 = math.exp %244 : vector<2x32xf32>
    %cst_84 = arith.constant 1.000000e+00 : f32
    %246 = vector.broadcast %cst_84 : f32 to vector<2x32xf32>
    %247 = arith.addf %246, %245 : vector<2x32xf32>
    %248 = arith.divf %246, %247 : vector<2x32xf32>
    %249 = vector.extract_strided_slice %242 {offsets = [0, 32], sizes = [2, 32], strides = [1, 1]} : vector<2x128xf32> to vector<2x32xf32>
    %250 = arith.negf %249 : vector<2x32xf32>
    %251 = math.exp %250 : vector<2x32xf32>
    %cst_85 = arith.constant 1.000000e+00 : f32
    %252 = vector.broadcast %cst_85 : f32 to vector<2x32xf32>
    %253 = arith.addf %252, %251 : vector<2x32xf32>
    %254 = arith.divf %252, %253 : vector<2x32xf32>
    %255 = vector.extract_strided_slice %242 {offsets = [0, 64], sizes = [2, 32], strides = [1, 1]} : vector<2x128xf32> to vector<2x32xf32>
    %256 = math.tanh %255 : vector<2x32xf32>
    %257 = vector.extract_strided_slice %242 {offsets = [0, 96], sizes = [2, 32], strides = [1, 1]} : vector<2x128xf32> to vector<2x32xf32>
    %258 = arith.negf %257 : vector<2x32xf32>
    %259 = math.exp %258 : vector<2x32xf32>
    %cst_86 = arith.constant 1.000000e+00 : f32
    %260 = vector.broadcast %cst_86 : f32 to vector<2x32xf32>
    %261 = arith.addf %260, %259 : vector<2x32xf32>
    %262 = arith.divf %260, %261 : vector<2x32xf32>
    %263 = arith.mulf %254, %227 : vector<2x32xf32>
    %264 = arith.mulf %248, %256 : vector<2x32xf32>
    %265 = arith.addf %263, %264 : vector<2x32xf32>
    %266 = math.tanh %265 : vector<2x32xf32>
    %267 = arith.mulf %262, %266 : vector<2x32xf32>
    %c0_87 = arith.constant 0 : index
    %268 = arith.index_cast %237 : i32 to index
    %c0_88 = arith.constant 0 : index
    %c0_89 = arith.constant 0 : index
    %269 = vector.load %arg5[%c0_87, %268, %c0_88, %c0_89] : memref<1x8x2x32xf32, #tpu.memory_space<vmem>>, vector<1x1x2x32xf32>
    %270 = vector.shape_cast %269 : vector<1x1x2x32xf32> to vector<2x32xf32>
    %271 = vector.shape_cast %267 : vector<2x32xf32> to vector<1x1x2x32xf32>
    tpu.vector_store %arg5[%c0_87, %268, %c0_88, %c0_89], %271 {strides = array<i32>} : memref<1x8x2x32xf32, #tpu.memory_space<vmem>>, vector<1x1x2x32xf32>,
    %c7_i32_90 = arith.constant 7 : i32
    %c2_i32_91 = arith.constant 2 : i32
    %272 = arith.muli %c2_i32_91, %c7_i32_90 : i32
    %c7_i32_92 = arith.constant 7 : i32
    %273 = arith.subi %c7_i32_92, %272 : i32
    %274 = arith.muli %arg0, %273 : i32
    %275 = arith.addi %c7_i32_90, %274 : i32
    %c0_93 = arith.constant 0 : index
    %276 = arith.index_cast %275 : i32 to index
    %c0_94 = arith.constant 0 : index
    %c0_95 = arith.constant 0 : index
    %277 = vector.load %arg1[%c0_93, %276, %c0_94, %c0_95] : memref<1x8x2x128xf32, #tpu.memory_space<vmem>>, vector<1x1x2x128xf32>
    %278 = vector.shape_cast %277 : vector<1x1x2x128xf32> to vector<2x128xf32>
    %cst_96 = arith.constant dense<0.000000e+00> : vector<2x128xf32>
    %279 = tpu.matmul %267, %1, %cst_96 {dimension_numbers = #tpu.dot_dimension_numbers<[1], [0], [0], [1], [0, 0, 1, 1], [], []>} : vector<2x32xf32>, vector<32x128xf32>, vector<2x128xf32> -> vector<2x128xf32>
    %280 = arith.addf %278, %279 : vector<2x128xf32>
    %281 = vector.extract_strided_slice %280 {offsets = [0, 0], sizes = [2, 32], strides = [1, 1]} : vector<2x128xf32> to vector<2x32xf32>
    %282 = arith.negf %281 : vector<2x32xf32>
    %283 = math.exp %282 : vector<2x32xf32>
    %cst_97 = arith.constant 1.000000e+00 : f32
    %284 = vector.broadcast %cst_97 : f32 to vector<2x32xf32>
    %285 = arith.addf %284, %283 : vector<2x32xf32>
    %286 = arith.divf %284, %285 : vector<2x32xf32>
    %287 = vector.extract_strided_slice %280 {offsets = [0, 32], sizes = [2, 32], strides = [1, 1]} : vector<2x128xf32> to vector<2x32xf32>
    %288 = arith.negf %287 : vector<2x32xf32>
    %289 = math.exp %288 : vector<2x32xf32>
    %cst_98 = arith.constant 1.000000e+00 : f32
    %290 = vector.broadcast %cst_98 : f32 to vector<2x32xf32>
    %291 = arith.addf %290, %289 : vector<2x32xf32>
    %292 = arith.divf %290, %291 : vector<2x32xf32>
    %293 = vector.extract_strided_slice %280 {offsets = [0, 64], sizes = [2, 32], strides = [1, 1]} : vector<2x128xf32> to vector<2x32xf32>
    %294 = math.tanh %293 : vector<2x32xf32>
    %295 = vector.extract_strided_slice %280 {offsets = [0, 96], sizes = [2, 32], strides = [1, 1]} : vector<2x128xf32> to vector<2x32xf32>
    %296 = arith.negf %295 : vector<2x32xf32>
    %297 = math.exp %296 : vector<2x32xf32>
    %cst_99 = arith.constant 1.000000e+00 : f32
    %298 = vector.broadcast %cst_99 : f32 to vector<2x32xf32>
    %299 = arith.addf %298, %297 : vector<2x32xf32>
    %300 = arith.divf %298, %299 : vector<2x32xf32>
    %301 = arith.mulf %292, %265 : vector<2x32xf32>
    %302 = arith.mulf %286, %294 : vector<2x32xf32>
    %303 = arith.addf %301, %302 : vector<2x32xf32>
    %304 = math.tanh %303 : vector<2x32xf32>
    %305 = arith.mulf %300, %304 : vector<2x32xf32>
    %c0_100 = arith.constant 0 : index
    %306 = arith.index_cast %275 : i32 to index
    %c0_101 = arith.constant 0 : index
    %c0_102 = arith.constant 0 : index
    %307 = vector.load %arg5[%c0_100, %306, %c0_101, %c0_102] : memref<1x8x2x32xf32, #tpu.memory_space<vmem>>, vector<1x1x2x32xf32>
    %308 = vector.shape_cast %307 : vector<1x1x2x32xf32> to vector<2x32xf32>
    %309 = vector.shape_cast %305 : vector<2x32xf32> to vector<1x1x2x32xf32>
    tpu.vector_store %arg5[%c0_100, %306, %c0_101, %c0_102], %309 {strides = array<i32>} : memref<1x8x2x32xf32, #tpu.memory_space<vmem>>, vector<1x1x2x32xf32>,
    %c8_i32 = arith.constant 8 : i32
    %c0_103 = arith.constant 0 : index
    %c0_104 = arith.constant 0 : index
    %c0_105 = arith.constant 0 : index
    %310 = vector.load %arg6[%c0_103, %c0_104, %c0_105] : memref<1x2x32xf32, #tpu.memory_space<vmem>>, vector<1x2x32xf32>
    %311 = vector.shape_cast %310 : vector<1x2x32xf32> to vector<2x32xf32>
    %312 = vector.shape_cast %305 : vector<2x32xf32> to vector<1x2x32xf32>
    tpu.vector_store %arg6[%c0_103, %c0_104, %c0_105], %312 {strides = array<i32>} : memref<1x2x32xf32, #tpu.memory_space<vmem>>, vector<1x2x32xf32>,
    %c0_106 = arith.constant 0 : index
    %c0_107 = arith.constant 0 : index
    %c0_108 = arith.constant 0 : index
    %313 = vector.load %arg7[%c0_106, %c0_107, %c0_108] : memref<1x2x32xf32, #tpu.memory_space<vmem>>, vector<1x2x32xf32>
    %314 = vector.shape_cast %313 : vector<1x2x32xf32> to vector<2x32xf32>
    %315 = vector.shape_cast %303 : vector<2x32xf32> to vector<1x2x32xf32>
    tpu.vector_store %arg7[%c0_106, %c0_107, %c0_108], %315 {strides = array<i32>} : memref<1x2x32xf32, #tpu.memory_space<vmem>>, vector<1x2x32xf32>,
    return
  }
  func.func @transform_0(%arg0: i32) -> (i32, i32, i32, i32) {
    %c0_i32 = arith.constant 0 : i32
    %c0_i32_0 = arith.constant 0 : i32
    %c0_i32_1 = arith.constant 0 : i32
    %c0_i32_2 = arith.constant 0 : i32
    return %arg0, %c0_i32, %c0_i32_0, %c0_i32_1 : i32, i32, i32, i32
  }
  func.func @transform_1(%arg0: i32) -> (i32, i32, i32) {
    %c0_i32 = arith.constant 0 : i32
    %c0_i32_0 = arith.constant 0 : i32
    %c0_i32_1 = arith.constant 0 : i32
    return %arg0, %c0_i32, %c0_i32_0 : i32, i32, i32
  }
  func.func @transform_2(%arg0: i32) -> (i32, i32, i32) {
    %c0_i32 = arith.constant 0 : i32
    %c0_i32_0 = arith.constant 0 : i32
    %c0_i32_1 = arith.constant 0 : i32
    return %arg0, %c0_i32, %c0_i32_0 : i32, i32, i32
  }
  func.func @transform_3(%arg0: i32) -> (i32, i32, i32) {
    %c0_i32 = arith.constant 0 : i32
    %c0_i32_0 = arith.constant 0 : i32
    %c0_i32_1 = arith.constant 0 : i32
    return %arg0, %c0_i32, %c0_i32_0 : i32, i32, i32
  }
  func.func @transform_4(%arg0: i32) -> (i32, i32, i32, i32) {
    %c0_i32 = arith.constant 0 : i32
    %c0_i32_0 = arith.constant 0 : i32
    %c0_i32_1 = arith.constant 0 : i32
    %c0_i32_2 = arith.constant 0 : i32
    return %arg0, %c0_i32, %c0_i32_0, %c0_i32_1 : i32, i32, i32, i32
  }
  func.func @transform_5(%arg0: i32) -> (i32, i32, i32) {
    %c0_i32 = arith.constant 0 : i32
    %c0_i32_0 = arith.constant 0 : i32
    %c0_i32_1 = arith.constant 0 : i32
    return %arg0, %c0_i32, %c0_i32_0 : i32, i32, i32
  }
  func.func @transform_6(%arg0: i32) -> (i32, i32, i32) {
    %c0_i32 = arith.constant 0 : i32
    %c0_i32_0 = arith.constant 0 : i32
    %c0_i32_1 = arith.constant 0 : i32
    return %arg0, %c0_i32, %c0_i32_0 : i32, i32, i32
  }
}

</mosaic_0001>

<bundles_post_ra>
// kernel: encoder_forward.1
= control target key start
LH: loop header
LB: loop body
LE: loop exit
PB: predicated region body
PF: predicated region fallthrough
CT: control target
= control target key end

     0   :  { %12 = vsyncpa [#allocation3], 0  ;;  %s2252_s0 = inlined_call_operand.vmem [shape: f32[2,8,2,128], index: 0, kind: input, shape index: {}]   ;;  %s2253_s1 = inlined_call_operand.vmem [shape: f32[2,32,128], index: 1, kind: input, shape index: {}]   ;;  %s2254_s2 = inlined_call_operand.vmem [shape: f32[2,2,32], index: 2, kind: input, shape index: {}]   ;;  %s2255_s3 = inlined_call_operand.vmem [shape: f32[2,2,32], index: 3, kind: input, shape index: {}]   ;;  %s2256_s4 = inlined_call_operand.vmem [shape: f32[2,8,2,32], index: 4, kind: output, shape index: {0}]   ;;  %s2257_s5 = inlined_call_operand.hbm [shape: f32[2,2,32], index: 5, kind: output, shape index: {1}]   ;;  %s2258_s6 = inlined_call_operand.hbm [shape: f32[2,2,32], index: 6, kind: output, shape index: {2}]  }
   0x1   :  { %14 = vsyncpa [#allocation3 + $0x1], 0 }
   0x2   :  { %15 = vsyncpa [#allocation5], 0 }
   0x3   :  { %17 = vsyncpa [#allocation5 + $0x1], 0  ;;  %s1947_s21 = smov 0   ;;  %s1949_s22 = smov 0  }
   0x4   :  { %s1951_s23 = smov 0   ;;  %s1953_s24 = smov 0  }
   0x5 LB: > { %s1968_s25 = sadd.s32 4294967295, %s1902_s24   ;;  %s1453_s26 = sadd.s32 4294967294, %s1902_s24   ;;  %s1902_s24 = sphi %s1953_s24, %s2266_s24   ;;  %s1898_s23 = sphi %s1951_s23, %s2265_s23   ;;  %s1894_s22 = sphi %s1949_s22, %s2264_s22   ;;  %s1890_s21 = sphi %s1947_s21, %s2263_s21  }
   0x6   : > { %s1972_s27 = sadd.s32 1, %s1902_s24   ;;  %s160_s28 = sadd.s32 1, %s1898_s23 }
   0x7   : > { %s157_s29 = ssub.s32 %s1902_s24, %s1972_s27  ;;  %p170_p0 = scmp.ne.s32.totalorder %s1898_s23, %s1894_s22 }
   0x8   : > { %p158_p1 = scmp.eq.s32.totalorder %s157_s29, 0  ;;  %p171_p2 = scmp.eq.s32.totalorder %s1968_s25, 1 }
   0x9   : > { %p176_p3 = scmp.ne.s32.totalorder %s1894_s22, %s1890_s21  ;;  %p177_p4 = scmp.eq.s32.totalorder %s1453_s26, 1 }
   0xa   : > { %s1983_s30 = scalar_select %p158_p1, %s1898_s23, %s160_s28  }
   0xb   : > { %p1985_p5 = por %p171_p2, %p170_p0  ;;  %p1989_p6 = por %p177_p4, %p176_p3 }
   0xc   : > { %p1456_p7 = scmp.ge.s32.totalorder %s1902_s24, 1  ;;  %p251_p8 = scmp.lt.s32.totalorder %s1902_s24, 3 }
   0xe   : > { %p252_p9 = pnand %p1456_p7, %p251_p8 }
   0xf   : > { %p304_p10 = scmp.lt.s32.totalorder (!%p252_p9), %s1968_s25, 1  ;;  %v1904_v0 = vmov (!%p252_p9), 0.0|0.0   ;;  %vm1905_vm0 = vmmov (!%p252_p9), 0   ;;  %v1906_v1 = vmov (!%p252_p9), 0.0   ;;  %vm337_vm1 = vcmask (!%p252_p9), 261120   ;;  %s1467_s19 = smul.u32 (!%p252_p9), 14, %s1968_s25 }
  0x10   : > { %255 = sbr.rel (%p252_p9) target bundleno = 5667 (0x1623), region = 36  ;;  %1646 = vmatprep.subr.bf16.mxu0 (!%p252_p9), %v1904_v0  ;;  %1566 = vmatprep.mubr.msk.f32.mxu0 (!%p252_p9), %vm1905_vm0, %v1906_v1  ;;  %s1908_s15 = smov (!%p252_p9), 32   ;;  %vm445_vm2 = vcmask (!%p252_p9), 254976  }
  0x11   : > { %1652 = vmatprep.subr.bf16.mxu1 (!%p252_p9), %v1904_v0  ;;  %1577 = vmatprep.mubr.msk.f32.mxu1 (!%p252_p9), %vm1905_vm0, %v1906_v1  ;;  %s1476_s26 = smul.u32 (!%p252_p9), 6, %s1968_s25  ;;  %s1482_s11 = sshll.u32 (!%p252_p9), %s1968_s25, 1 }
  0x12   : > { %s770_s16 = ssub.s32 (!%p252_p9), 4, %s1968_s25 }
  0x17   : > { %s2000_s9 = scalar_select %p304_p10, %s1968_s25, 1 }
  0x19   : > { %s1516_s10 = sshll.u32 %s2000_s9, 5  ;;  %s1463_s14 = sshll.u32 %s2000_s9, 1 }
  0x1a   : > { %s313_s13 = scalar_lea.vmem %s2253_s1, %s1516_s10  ;;  %s317_s17 = scalar_lea.vmem %s2254_s2, %s1463_s14 }
  0x1b   : > { %v327_v2 = vld [vmem:[%s313_s13] sm:$0xff]  ;;  %v328_v3 = vld [vmem:[%s313_s13 + $0x8] sm:$0xff]  ;;  %v329_v4 = vld [vmem:[%s313_s13 + $0x10] sm:$0xff]  ;;  %s1515_s18 = sshll.u32 %s2000_s9, 4  ;;  %s321_s12 = scalar_lea.vmem %s2255_s3, %s1463_s14 }
  0x1c   : > { %v2009_v5 = vpack.c.bf16 %v328_v3, %v327_v2  ;;  %v330_v6 = vld [vmem:[%s313_s13 + $0x18] sm:$0xff]  ;;  %v331_v8 = vld [vmem:[%s317_s17] sm:$0x3]  ;;  %s2039_s28 = scalar_lea.vmem %s2252_s0, %s1515_s18  ;;  %s1907_s13 = smov 64  }
  0x1d   : > { %v2013_v7 = vpack.c.bf16 %v330_v6, %v329_v4  ;;  %s335_s29 = scalar_lea.vmem %s2039_s28, %s1467_s19  ;;  %v332_v14 = vld [vmem:[%s321_s12] sm:$0x3]  ;;  %s2057_s17 = scalar_lea.vmem %s2256_s4, %s1515_s18 }
  0x1e   : > { %1648 = vmatpush3.bf16.msra.mxu0 %v2009_v5  ;;  %1654 = vmatpush3.bf16.msra.mxu1 %v2009_v5  ;;  %v336_v9 = vld [vmem:[%s335_s29] sm:$0x3]  ;;  %s444_s20 = scalar_lea.vmem %s2057_s17, %s1467_s19  ;;  %s1470_s9 = smul.u32 10, %s1968_s25 }
  0x1f   : > { %1649 = vmatprep.subr.bf16.mxu0 %v1904_v0  ;;  %1655 = vmatprep.subr.bf16.mxu1 %v1904_v0  ;;  %s1336_s29 = scalar_lea.vmem %s2039_s28, %s1476_s26  ;;  %s1340_s10 = scalar_lea.vmem %s2057_s17, %s1476_s26 }
  0x20   : > { %s1328_s18 = scalar_lea.vmem %s2039_s28, %s1470_s9  ;;  %s1332_s19 = scalar_lea.vmem %s2057_s17, %s1470_s9  ;;  %v1477_v47 = vld [vmem:[%s1336_s29 + $0x4] sm:$0x3] }
  0x21   : > { %v1471_v29 = vld [vmem:[%s1328_s18 + $0x2] sm:$0x3]  ;;  %s1343_s12 = scalar_lea.vmem %s2039_s28, %s1482_s11  ;;  %s1346_s14 = scalar_lea.vmem %s2057_s17, %s1482_s11 }
  0x22   : > { %1651 = vmatpush3.bf16.msra.mxu0 %v2013_v7  ;;  %1657 = vmatpush3.bf16.msra.mxu1 %v2013_v7  ;;  %v1483_v3 = vld [vmem:[%s1343_s12 + $0x6] sm:$0x3] }
  0x23   : > { %1658 = vmatprep.subr.bf16.mxu0 %v1904_v0  ;;  %1664 = vmatprep.subr.bf16.mxu1 %v1904_v0 }
  0x25   : > { %1567 = vmatmul.mubr.msk.f32.vlgmr.msra.gmra.mrb[0].mxu0 %vm337_vm1, %v331_v8 }
  0x26   : > { %1660 = vmatpush3.bf16.msra.mxu0 %v2009_v5  ;;  %1588 = vmatprep.mubr.msk.f32.mxu0 %vm1905_vm0, %v1906_v1 }
  0x27   : > { %1661 = vmatprep.subr.bf16.mxu0 %v1904_v0 }
  0x2a   : > { %1663 = vmatpush3.bf16.msra.mxu0 %v2013_v7 }
  0x2b   : > { %1670 = vmatprep.subr.bf16.mxu0 %v1904_v0 }
  0xf8   : > { %v407_v10 = vpop.f32.mrb[0].mxu0 }
  0xf9   : > { %v411_v11 = vadd.f32 %v407_v10, %v336_v9  ;;  %v1568_v12 = vpop.f32.mrb[1].mxu0 }
  0xfb   : > { %1744 = vtanh.f32 %v411_v11  ;;  %v1469_v15 = vmul.f32 -1.442695, %v411_v11 }
  0xfd   : > { %1746 = vpow2.f32 %v1469_v15 }
 0x105   : > { %v1745_v13 = vpop.eup %1744 }
 0x106   : > { %425 = vrot.lane.b32.xlu0 %v1745_v13, %s1907_s13 }
 0x107   : > { %v1747_v16 = vpop.eup %1746 }
 0x108   : > { %v415_v17 = vadd.f32 1.0, %v1747_v16 }
 0x10a   : > { %420 = vrot.lane.b32.xlu0 %v332_v14, %s1908_s15  ;;  %1748 = vrcp.f32 %v415_v17 }
 0x114   : > { %v1749_v18 = vpop.eup %1748 }
 0x178   : > { %v426_v19 = vpop.permute.xlu0 %425 }
 0x179   : > { %v428_v20 = vmul.f32 %v1749_v18, %v426_v19 }
 0x17b   : > { %430 = vrot.lane.b32.xlu1 %v428_v20, %s1908_s15 }
 0x17c   : > { %v421_v21 = vpop.permute.xlu0 %420 }
 0x17d   : > { %v423_v22 = vmul.f32 %v1749_v18, %v421_v21 }
 0x1ed   : > { %v431_v23 = vpop.permute.xlu1 %430 }
 0x1ee   : > { %v433_v24 = vadd.f32 %v431_v23, %v423_v22 }
 0x1f0   : > { %1750 = vtanh.f32 %v433_v24 }
 0x1fa   : > { %v1751_v25 = vpop.eup %1750 }
 0x1fb   : > { %436 = vrot.lane.b32.xlu1 %v1751_v25, %s1907_s13 }
 0x26d   : > { %v437_v26 = vpop.permute.xlu1 %436 }
 0x26e   : > { %v439_v27 = vmul.f32 %v1749_v18, %v437_v26 }
 0x270   : > { %441 = vrot.lane.b32.xlu0 %v439_v27, %s1908_s15 }
 0x2e2   : > { %v442_v28 = vpop.permute.xlu0 %441 }
 0x2e3   : > { %446 = vst.msk [vmem:[%s444_s20] sm:$0x3] %vm445_vm2, %v442_v28  ;;  %1578 = vmatmul.mubr.msk.f32.vlgmr.msra.gmra.mrb[0].mxu1 %vm337_vm1, %v442_v28  ;;  %s2115_s20 = sshll.u32 %s770_s16, 1 }
 0x2e4   : > { %1666 = vmatpush3.bf16.msra.mxu1 %v2009_v5  ;;  %1599 = vmatprep.mubr.msk.f32.mxu1 %vm1905_vm0, %v1906_v1  ;;  %s772_s9 = scalar_lea.vmem %s2039_s28, %s2115_s20  ;;  %s875_s18 = scalar_lea.vmem %s2057_s17, %s2115_s20 }
 0x2e5   : > { %1667 = vmatprep.subr.bf16.mxu1 %v1904_v0  ;;  %v773_v23 = vld [vmem:[%s772_s9] sm:$0x3]  ;;  %s2158_s20 = sand.u32 1, %s1894_s22  }
 0x2e6   : > { %s1457_s9 = sshll.u32 %s2158_s20, 1 }
 0x2e8   : > { %1669 = vmatpush3.bf16.msra.mxu1 %v2013_v7 }
 0x2e9   : > { %1676 = vmatprep.subr.bf16.mxu1 %v1904_v0 }
 0x3b6   : > { %v520_v30 = vpop.f32.mrb[0].mxu1 }
 0x3b7   : > { %v524_v31 = vadd.f32 %v1471_v29, %v520_v30  ;;  %v1579_v32 = vpop.f32.mrb[1].mxu1 }
 0x3b9   : > { %1752 = vtanh.f32 %v524_v31  ;;  %v1473_v34 = vmul.f32 -1.442695, %v524_v31 }
 0x3bb   : > { %1754 = vpow2.f32 %v1473_v34 }
 0x3c3   : > { %v1753_v33 = vpop.eup %1752 }
 0x3c4   : > { %534 = vrot.lane.b32.xlu1 %v1753_v33, %s1907_s13 }
 0x3c5   : > { %v1755_v35 = vpop.eup %1754 }
 0x3c6   : > { %v528_v36 = vadd.f32 1.0, %v1755_v35 }
 0x3c8   : > { %1756 = vrcp.f32 %v528_v36 }
 0x3d2   : > { %v1757_v37 = vpop.eup %1756 }
 0x3d3   : > { %v532_v40 = vmul.f32 %v1757_v37, %v433_v24 }
 0x436   : > { %v535_v38 = vpop.permute.xlu1 %534 }
 0x437   : > { %v537_v39 = vmul.f32 %v1757_v37, %v535_v38 }
 0x439   : > { %539 = vrot.lane.b32.xlu0 %v537_v39, %s1908_s15 }
 0x4ab   : > { %v540_v41 = vpop.permute.xlu0 %539 }
 0x4ac   : > { %v542_v42 = vadd.f32 %v540_v41, %v532_v40 }
 0x4ae   : > { %1758 = vtanh.f32 %v542_v42 }
 0x4b8   : > { %v1759_v43 = vpop.eup %1758 }
 0x4b9   : > { %545 = vrot.lane.b32.xlu1 %v1759_v43, %s1907_s13 }
 0x52b   : > { %v546_v44 = vpop.permute.xlu1 %545 }
 0x52c   : > { %v548_v45 = vmul.f32 %v1757_v37, %v546_v44 }
 0x52e   : > { %550 = vrot.lane.b32.xlu0 %v548_v45, %s1908_s15 }
 0x5a0   : > { %v551_v46 = vpop.permute.xlu0 %550 }
 0x5a1   : > { %1475 = vst.msk [vmem:[%s1332_s19 + $0x2] sm:$0x3] %vm445_vm2, %v551_v46  ;;  %1589 = vmatmul.mubr.msk.f32.vlgmr.msra.gmra.mrb[2].mxu0 %vm337_vm1, %v551_v46  ;;  %s1491_s19 = smul.u32 4294967290, %s1968_s25 }
 0x5a2   : > { %1672 = vmatpush3.bf16.msra.mxu0 %v2009_v5  ;;  %1610 = vmatprep.mubr.msk.f32.mxu0 %vm1905_vm0, %v1906_v1 }
 0x5a3   : > { %1673 = vmatprep.subr.bf16.mxu0 %v1904_v0  ;;  %s1354_s26 = scalar_lea.vmem %s2039_s28, %s1491_s19  ;;  %s1358_s29 = scalar_lea.vmem %s2057_s17, %s1491_s19 }
 0x5a4   : > { %v1492_v41 = vld [vmem:[%s1354_s26 + $0xa] sm:$0x3]  ;;  %s303_s19 = scalar_lea.vmem [#allocation4], %s1457_s9 }
 0x5a5   : > { %s1247_s26 = sshll.u32 %s303_s19, 4  ;;  %s2172_s26 = int_to_ptr.vmem [resolvable:$true] %s1247_s26 }
 0x5a6   : > { %1675 = vmatpush3.bf16.msra.mxu0 %v2013_v7 }
 0x5a7   : > { %1682 = vmatprep.subr.bf16.mxu0 %v1904_v0 }
 0x674   : > { %v628_v48 = vpop.f32.mrb[2].mxu0 }
 0x675   : > { %v632_v49 = vadd.f32 %v1477_v47, %v628_v48  ;;  %v1590_v50 = vpop.f32.mrb[3].mxu0 }
 0x677   : > { %1760 = vtanh.f32 %v632_v49  ;;  %v1479_v52 = vmul.f32 -1.442695, %v632_v49 }
 0x679   : > { %1762 = vpow2.f32 %v1479_v52 }
 0x681   : > { %v1761_v51 = vpop.eup %1760 }
 0x682   : > { %642 = vrot.lane.b32.xlu1 %v1761_v51, %s1907_s13 }
 0x683   : > { %v1763_v53 = vpop.eup %1762 }
 0x684   : > { %v636_v54 = vadd.f32 1.0, %v1763_v53 }
 0x686   : > { %1764 = vrcp.f32 %v636_v54 }
 0x690   : > { %v1765_v55 = vpop.eup %1764 }
 0x691   : > { %v640_v58 = vmul.f32 %v1765_v55, %v542_v42 }
 0x6f4   : > { %v643_v56 = vpop.permute.xlu1 %642 }
 0x6f5   : > { %v645_v57 = vmul.f32 %v1765_v55, %v643_v56 }
 0x6f7   : > { %647 = vrot.lane.b32.xlu0 %v645_v57, %s1908_s15 }
 0x769   : > { %v648_v59 = vpop.permute.xlu0 %647 }
 0x76a   : > { %v650_v60 = vadd.f32 %v648_v59, %v640_v58 }
 0x76c   : > { %1766 = vtanh.f32 %v650_v60 }
 0x776   : > { %v1767_v61 = vpop.eup %1766 }
 0x777   : > { %653 = vrot.lane.b32.xlu1 %v1767_v61, %s1907_s13 }
 0x7e9   : > { %v654_v62 = vpop.permute.xlu1 %653 }
 0x7ea   : > { %v656_v63 = vmul.f32 %v1765_v55, %v654_v62 }
 0x7ec   : > { %658 = vrot.lane.b32.xlu0 %v656_v63, %s1908_s15 }
 0x85e   : > { %v659_v2 = vpop.permute.xlu0 %658 }
 0x85f   : > { %1481 = vst.msk [vmem:[%s1340_s10 + $0x4] sm:$0x3] %vm445_vm2, %v659_v2  ;;  %1600 = vmatmul.mubr.msk.f32.vlgmr.msra.gmra.mrb[2].mxu1 %vm337_vm1, %v659_v2  ;;  %s1497_s10 = smul.u32 4294967286, %s1968_s25 }
 0x860   : > { %1678 = vmatpush3.bf16.msra.mxu1 %v2009_v5  ;;  %1621 = vmatprep.mubr.msk.f32.mxu1 %vm1905_vm0, %v1906_v1 }
 0x861   : > { %1679 = vmatprep.subr.bf16.mxu1 %v1904_v0  ;;  %s1362_s11 = scalar_lea.vmem %s2039_s28, %s1497_s10  ;;  %s1366_s12 = scalar_lea.vmem %s2057_s17, %s1497_s10 }
 0x862   : > { %v1498_v55 = vld [vmem:[%s1362_s11 + $0xc] sm:$0x3]  ;;  %s1218_s11 = scalar_lea.sflag [#allocation5], %s2158_s20 }
 0x864   : > { %1681 = vmatpush3.bf16.msra.mxu1 %v2013_v7 }
 0x865   : > { %1688 = vmatprep.subr.bf16.mxu1 %v1904_v0 }
 0x932   : > { %v735_v4 = vpop.f32.mrb[2].mxu1 }
 0x933   : > { %v739_v6 = vadd.f32 %v1483_v3, %v735_v4  ;;  %v1601_v8 = vpop.f32.mrb[3].mxu1 }
 0x935   : > { %1768 = vtanh.f32 %v739_v6  ;;  %v1485_v10 = vmul.f32 -1.442695, %v739_v6 }
 0x937   : > { %1770 = vpow2.f32 %v1485_v10 }
 0x93f   : > { %v1769_v9 = vpop.eup %1768 }
 0x940   : > { %749 = vrot.lane.b32.xlu1 %v1769_v9, %s1907_s13 }
 0x941   : > { %v1771_v11 = vpop.eup %1770 }
 0x942   : > { %v743_v12 = vadd.f32 1.0, %v1771_v11 }
 0x944   : > { %1772 = vrcp.f32 %v743_v12 }
 0x94e   : > { %v1773_v13 = vpop.eup %1772 }
 0x94f   : > { %v747_v16 = vmul.f32 %v1773_v13, %v650_v60 }
 0x9b2   : > { %v750_v14 = vpop.permute.xlu1 %749 }
 0x9b3   : > { %v752_v15 = vmul.f32 %v1773_v13, %v750_v14 }
 0x9b5   : > { %754 = vrot.lane.b32.xlu0 %v752_v15, %s1908_s15 }
 0xa27   : > { %v755_v17 = vpop.permute.xlu0 %754 }
 0xa28   : > { %v757_v18 = vadd.f32 %v755_v17, %v747_v16 }
 0xa2a   : > { %1774 = vtanh.f32 %v757_v18 }
 0xa34   : > { %v1775_v19 = vpop.eup %1774 }
 0xa35   : > { %760 = vrot.lane.b32.xlu1 %v1775_v19, %s1907_s13 }
 0xaa7   : > { %v761_v20 = vpop.permute.xlu1 %760 }
 0xaa8   : > { %v763_v21 = vmul.f32 %v1773_v13, %v761_v20 }
 0xaaa   : > { %765 = vrot.lane.b32.xlu0 %v763_v21, %s1908_s15 }
 0xb1c   : > { %v766_v22 = vpop.permute.xlu0 %765 }
 0xb1d   : > { %1487 = vst.msk [vmem:[%s1346_s14 + $0x6] sm:$0x3] %vm445_vm2, %v766_v22  ;;  %1611 = vmatmul.mubr.msk.f32.vlgmr.msra.gmra.mrb[4].mxu0 %vm337_vm1, %v766_v22  ;;  %s1503_s14 = smul.u32 4294967282, %s1968_s25 }
 0xb1e   : > { %1684 = vmatpush3.bf16.msra.mxu0 %v2009_v5  ;;  %1632 = vmatprep.mubr.msk.f32.mxu0 %vm1905_vm0, %v1906_v1 }
 0xb1f   : > { %1685 = vmatprep.subr.bf16.mxu0 %v1904_v0  ;;  %s1370_s16 = scalar_lea.vmem %s2039_s28, %s1503_s14  ;;  %s1909_s28 = smov 96  }
 0xb20   : > { %v1504_v13 = vld [vmem:[%s1370_s16 + $0xe] sm:$0x3] }
 0xb22   : > { %1687 = vmatpush3.bf16.msra.mxu0 %v2013_v7 }
 0xbf0   : > { %v842_v24 = vpop.f32.mrb[4].mxu0 }
 0xbf1   : > { %v846_v25 = vadd.f32 %v842_v24, %v773_v23  ;;  %v1612_v26 = vpop.f32.mrb[5].mxu0 }
 0xbf3   : > { %1776 = vtanh.f32 %v846_v25  ;;  %v1490_v28 = vmul.f32 -1.442695, %v846_v25 }
 0xbf5   : > { %1778 = vpow2.f32 %v1490_v28 }
 0xbfd   : > { %v1777_v27 = vpop.eup %1776 }
 0xbfe   : > { %856 = vrot.lane.b32.xlu1 %v1777_v27, %s1907_s13 }
 0xbff   : > { %v1779_v29 = vpop.eup %1778 }
 0xc00   : > { %v850_v30 = vadd.f32 1.0, %v1779_v29 }
 0xc02   : > { %1780 = vrcp.f32 %v850_v30 }
 0xc0c   : > { %v1781_v31 = vpop.eup %1780 }
 0xc0d   : > { %v854_v34 = vmul.f32 %v1781_v31, %v757_v18 }
 0xc70   : > { %v857_v32 = vpop.permute.xlu1 %856 }
 0xc71   : > { %v859_v33 = vmul.f32 %v1781_v31, %v857_v32 }
 0xc73   : > { %861 = vrot.lane.b32.xlu0 %v859_v33, %s1908_s15 }
 0xce5   : > { %v862_v35 = vpop.permute.xlu0 %861 }
 0xce6   : > { %v864_v36 = vadd.f32 %v862_v35, %v854_v34 }
 0xce8   : > { %1782 = vtanh.f32 %v864_v36 }
 0xcf2   : > { %v1783_v37 = vpop.eup %1782 }
 0xcf3   : > { %867 = vrot.lane.b32.xlu1 %v1783_v37, %s1907_s13 }
 0xd65   : > { %v868_v38 = vpop.permute.xlu1 %867 }
 0xd66   : > { %v870_v39 = vmul.f32 %v1781_v31, %v868_v38 }
 0xd68   : > { %872 = vrot.lane.b32.xlu0 %v870_v39, %s1908_s15 }
 0xdda   : > { %v873_v40 = vpop.permute.xlu0 %872 }
 0xddb   : > { %876 = vst.msk [vmem:[%s875_s18] sm:$0x3] %vm445_vm2, %v873_v40  ;;  %1622 = vmatmul.mubr.msk.f32.vlgmr.msra.gmra.mrb[4].mxu1 %vm337_vm1, %v873_v40  ;;  %s2259_s18 = sshll.u32 %s1968_s25, 5 }
 0xddc   : > { %1690 = vmatpush3.bf16.msra.mxu1 %v2009_v5  ;;  %1643 = vmatprep.mubr.msk.f32.mxu1 %vm1905_vm0, %v1906_v1  ;;  %s2170_s10 = scalar_lea.hbm %s2258_s6, %s2259_s18 }
 0xddd   : > { %1691 = vmatprep.subr.bf16.mxu1 %v1904_v0 }
 0xde0   : > { %1693 = vmatpush3.bf16.msra.mxu1 %v2013_v7 }
 0xeae   : > { %v950_v42 = vpop.f32.mrb[4].mxu1 }
 0xeaf   : > { %v954_v43 = vadd.f32 %v1492_v41, %v950_v42  ;;  %v1623_v44 = vpop.f32.mrb[5].mxu1 }
 0xeb1   : > { %1784 = vtanh.f32 %v954_v43  ;;  %v1494_v46 = vmul.f32 -1.442695, %v954_v43 }
 0xeb3   : > { %1786 = vpow2.f32 %v1494_v46 }
 0xebb   : > { %v1785_v45 = vpop.eup %1784 }
 0xebc   : > { %964 = vrot.lane.b32.xlu1 %v1785_v45, %s1907_s13 }
 0xebd   : > { %v1787_v5 = vpop.eup %1786 }
 0xebe   : > { %v958_v47 = vadd.f32 1.0, %v1787_v5 }
 0xec0   : > { %1788 = vrcp.f32 %v958_v47 }
 0xeca   : > { %v1789_v1 = vpop.eup %1788 }
 0xecb   : > { %v962_v48 = vmul.f32 %v1789_v1, %v864_v36 }
 0xf2e   : > { %v965_v0 = vpop.permute.xlu1 %964 }
 0xf2f   : > { %v967_v7 = vmul.f32 %v1789_v1, %v965_v0 }
 0xf31   : > { %969 = vrot.lane.b32.xlu0 %v967_v7, %s1908_s15 }
 0xfa3   : > { %v970_v49 = vpop.permute.xlu0 %969 }
 0xfa4   : > { %v972_v50 = vadd.f32 %v970_v49, %v962_v48 }
 0xfa6   : > { %1790 = vtanh.f32 %v972_v50 }
 0xfb0   : > { %v1791_v51 = vpop.eup %1790 }
 0xfb1   : > { %975 = vrot.lane.b32.xlu1 %v1791_v51, %s1907_s13 }
0x1023   : > { %v976_v52 = vpop.permute.xlu1 %975 }
0x1024   : > { %v978_v53 = vmul.f32 %v1789_v1, %v976_v52 }
0x1026   : > { %980 = vrot.lane.b32.xlu0 %v978_v53, %s1908_s15 }
0x1098   : > { %v981_v54 = vpop.permute.xlu0 %980 }
0x1099   : > { %1496 = vst.msk [vmem:[%s1358_s29 + $0xa] sm:$0x3] %vm445_vm2, %v981_v54  ;;  %1633 = vmatmul.mubr.msk.f32.vlgmr.msra.gmra.mrb[6].mxu0 %vm337_vm1, %v981_v54 }
0x116c   : > { %v1058_v56 = vpop.f32.mrb[6].mxu0 }
0x116d   : > { %v1062_v57 = vadd.f32 %v1498_v55, %v1058_v56  ;;  %v1634_v58 = vpop.f32.mrb[7].mxu0 }
0x116f   : > { %1792 = vtanh.f32 %v1062_v57  ;;  %v1500_v60 = vmul.f32 -1.442695, %v1062_v57 }
0x1171   : > { %1794 = vpow2.f32 %v1500_v60 }
0x1179   : > { %v1793_v59 = vpop.eup %1792 }
0x117a   : > { %1072 = vrot.lane.b32.xlu1 %v1793_v59, %s1907_s13 }
0x117b   : > { %v1795_v61 = vpop.eup %1794 }
0x117c   : > { %v1066_v62 = vadd.f32 1.0, %v1795_v61 }
0x117e   : > { %1796 = vrcp.f32 %v1066_v62 }
0x1188   : > { %v1797_v63 = vpop.eup %1796 }
0x1189   : > { %v1070_v4 = vmul.f32 %v1797_v63, %v972_v50 }
0x11ec   : > { %v1073_v2 = vpop.permute.xlu1 %1072 }
0x11ed   : > { %v1075_v3 = vmul.f32 %v1797_v63, %v1073_v2 }
0x11ef   : > { %1077 = vrot.lane.b32.xlu0 %v1075_v3, %s1908_s15 }
0x1261   : > { %v1078_v6 = vpop.permute.xlu0 %1077 }
0x1262   : > { %v1080_v8 = vadd.f32 %v1078_v6, %v1070_v4 }
0x1264   : > { %1798 = vtanh.f32 %v1080_v8 }
0x126e   : > { %v1799_v9 = vpop.eup %1798 }
0x126f   : > { %1083 = vrot.lane.b32.xlu1 %v1799_v9, %s1907_s13 }
0x12e1   : > { %v1084_v10 = vpop.permute.xlu1 %1083 }
0x12e2   : > { %v1086_v11 = vmul.f32 %v1797_v63, %v1084_v10 }
0x12e4   : > { %1088 = vrot.lane.b32.xlu0 %v1086_v11, %s1908_s15 }
0x1356   : > { %v1089_v12 = vpop.permute.xlu0 %1088 }
0x1357   : > { %1502 = vst.msk [vmem:[%s1366_s12 + $0xc] sm:$0x3] %vm445_vm2, %v1089_v12  ;;  %1644 = vmatmul.mubr.msk.f32.vlgmr.msra.gmra.mrb[6].mxu1 %vm337_vm1, %v1089_v12  ;;  %s1808_s12 = scalar_lea.vmem %s2172_s26, 32 }
0x1358   : > { %p1809_p11 = scmp.ne.s32.totalorder %s2172_s26, %s1808_s12 }
0x135a   : > { %p1810_p12 = pnand %p1809_p11, %p1985_p5 }
0x135c   : > { %p1811_p13 = pneg %p1810_p12 }
0x142a   : > { %v1166_v14 = vpop.f32.mrb[6].mxu1 }
0x142b   : > { %v1170_v15 = vadd.f32 %v1504_v13, %v1166_v14  ;;  %v1645_v16 = vpop.f32.mrb[7].mxu1 }
0x142d   : > { %1800 = vtanh.f32 %v1170_v15  ;;  %v1506_v18 = vmul.f32 -1.442695, %v1170_v15 }
0x142f   : > { %1802 = vpow2.f32 %v1506_v18 }
0x1437   : > { %v1801_v17 = vpop.eup %1800 }
0x1438   : > { %1180 = vrot.lane.b32.xlu1 %v1801_v17, %s1907_s13 }
0x1439   : > { %v1803_v19 = vpop.eup %1802 }
0x143a   : > { %v1174_v20 = vadd.f32 1.0, %v1803_v19 }
0x143c   : > { %1804 = vrcp.f32 %v1174_v20 }
0x1446   : > { %v1805_v21 = vpop.eup %1804 }
0x1447   : > { %v1178_v24 = vmul.f32 %v1805_v21, %v1080_v8 }
0x14aa   : > { %v1181_v22 = vpop.permute.xlu1 %1180 }
0x14ab   : > { %v1183_v23 = vmul.f32 %v1805_v21, %v1181_v22 }
0x14ad   : > { %1185 = vrot.lane.b32.xlu0 %v1183_v23, %s1908_s15 }
0x151f   : > { %v1186_v25 = vpop.permute.xlu0 %1185 }
0x1520   : > { %v1188_v26 = vadd.f32 %v1186_v25, %v1178_v24 }
0x1522   : > { %1806 = vtanh.f32 %v1188_v26 }
0x152c   : > { %v1807_v27 = vpop.eup %1806 }
0x152d   : > { %1191 = vrot.lane.b32.xlu1 %v1807_v27, %s1907_s13 }
0x1531   : > { %1203 = vrot.lane.b32.xlu1 %v1188_v26, %s1909_s28 }
0x159f   : > { %v1192_v28 = vpop.permute.xlu1 %1191 }
0x15a0   : > { %v1194_v29 = vmul.f32 %v1805_v21, %v1192_v28 }
0x15a2   : > { %1196 = vrot.lane.b32.xlu0 %v1194_v29, %s1908_s15  ;;  %s1910_s15 = smov [#allocation4]  }
0x15a3   : > { %v1204_v30 = vpop.permute.xlu1 %1203  ;;  %s1812_s16 = sshll.u32 %s1910_s15, 4  ;;  %s1813_s16 = int_to_ptr.vmem [resolvable:$false] %s1812_s16 }
0x15a4   : > { %1206 = vst.msk [vmem:[%s303_s19] sm:$0x3] %vm445_vm2, %v1204_v30  ;;  %s1814_s28 = scalar_lea.vmem %s1813_s16, 64  ;;  %p1815_p0 = scmp.lt.s32.totalorder %s2172_s26, %s1813_s16 }
0x15a5   : > { %p1816_p1 = scmp.lt.s32.totalorder %s1814_s28, %s1808_s12 }
0x15a7   : > { %p1817_p2 = por %p1816_p1, %p1815_p0 }
0x15a9   : > { %p1818_p3 = pnand %p1817_p2, %p1811_p13 }
0x15ab   : > { %1821 = shalt.err (!%p1818_p3)
}
0x15ac   : > { %s1822_s19 = scalar_lea.hbm %s2170_s10, 32  ;;  %s1826_s15 = scalar_lea.hbm %s2258_s6, 64 }
0x15ad   : > { %p1823_p4 = scmp.ne.s32.totalorder %s2170_s10, %s1822_s19  ;;  %p1827_p9 = scmp.lt.u32.totalorder %s2170_s10, %s2258_s6 }
0x15ae   : > { %p1828_p10 = scmp.lt.u32.totalorder %s1826_s15, %s1822_s19  ;;  %p1830_p12 = scmp.lt.u32.totalorder %s1822_s19, %s2170_s10 }
0x15af   : > { %p1824_p7 = pnand %p1823_p4, %p1985_p5 }
0x15b0   : > { %p1829_p11 = por %p1828_p10, %p1827_p9 }
0x15b1   : > { %p1825_p8 = pneg %p1824_p7 }
0x15b2   : > { %p1831_p13 = por %p1830_p12, %p1829_p11 }
0x15b4   : > { %p1832_p0 = pnand %p1831_p13, %p1825_p8 }
0x15b6   : > { %1835 = shalt.err (!%p1832_p0)
}
0x15b7   : > { %1695 = dma.vmem_to_hbm [thread:$0]  (%p1985_p5), %s2172_s26, 32, %s2170_s10, %s1218_s11  }
0x15b8   : > { %s296_s18 = scalar_lea.vmem [#allocation2], %s1457_s9  ;;  %s1374_s28 = scalar_lea.vmem %s2057_s17, %s1503_s14 }
0x15b9   : > { %s1234_s12 = sshll.u32 %s296_s18, 4  ;;  %s2262_s19 = sshll.u32 %s1968_s25, 5  ;;  %s2209_s12 = int_to_ptr.vmem [resolvable:$true] %s1234_s12 }
0x15ba   : > { %s2207_s15 = scalar_lea.hbm %s2257_s5, %s2262_s19  ;;  %s1213_s9 = scalar_lea.sflag [#allocation3], %s2158_s20 }
0x15bb   : > { %s1836_s26 = scalar_lea.vmem %s2209_s12, 32  ;;  %s1911_s25 = smov [#allocation2]  }
0x15bc   : > { %p1837_p1 = scmp.ne.s32.totalorder %s2209_s12, %s1836_s26  ;;  %s1840_s17 = sshll.u32 %s1911_s25, 4  ;;  %s1841_s17 = int_to_ptr.vmem [resolvable:$false] %s1840_s17 }
0x15bd   : > { %s1842_s14 = scalar_lea.vmem %s1841_s17, 64  ;;  %p1843_p4 = scmp.lt.s32.totalorder %s2209_s12, %s1841_s17 }
0x15be   : > { %p1838_p2 = pnand %p1837_p1, %p1985_p5  ;;  %p1844_p7 = scmp.lt.s32.totalorder %s1842_s14, %s1836_s26 }
0x15c0   : > { %p1839_p3 = pneg %p1838_p2  ;;  %p1845_p8 = por %p1844_p7, %p1843_p4 }
0x15c2   : > { %p1846_p9 = pnand %p1845_p8, %p1839_p3 }
0x1614   : > { %v1197_v31 = vpop.permute.xlu0 %1196 }
0x1615   : > { %1508 = vst.msk [vmem:[%s1374_s28 + $0xe] sm:$0x3] %vm445_vm2, %v1197_v31  ;;  %1201 = vst.msk [vmem:[%s296_s18] sm:$0x3] %vm445_vm2, %v1197_v31 }
0x1616   : > { %1849 = shalt.err (!%p1846_p9)
}
0x1617   : > { %s1850_s20 = scalar_lea.hbm %s2207_s15, 32  ;;  %s1854_s16 = scalar_lea.hbm %s2257_s5, 64 }
0x1618   : > { %p1851_p10 = scmp.ne.s32.totalorder %s2207_s15, %s1850_s20  ;;  %p1855_p13 = scmp.lt.u32.totalorder %s2207_s15, %s2257_s5 }
0x1619   : > { %p1856_p0 = scmp.lt.u32.totalorder %s1854_s16, %s1850_s20  ;;  %p1858_p2 = scmp.lt.u32.totalorder %s1850_s20, %s2207_s15 }
0x161a   : > { %p1852_p11 = pnand %p1851_p10, %p1985_p5 }
0x161b   : > { %p1857_p1 = por %p1856_p0, %p1855_p13 }
0x161c   : > { %p1853_p12 = pneg %p1852_p11 }
0x161d   : > { %p1859_p3 = por %p1858_p2, %p1857_p1 }
0x161f   : > { %p1860_p4 = pnand %p1859_p3, %p1853_p12 }
0x1621   : > { %1863 = shalt.err (!%p1860_p4)
}
0x1622   : > { %1694 = dma.vmem_to_hbm [thread:$0]  (%p1985_p5), %s2209_s12, 32, %s2207_s15, %s1213_s9  }
0x1623 PF: > { %p1705_p7 = scmp.ge.s32.totalorder %s1902_s24, 2  ;;  %s1267_s19 = sand.u32 1, %s1890_s21  }
0x1624   : > { %s1268_s29 = scalar_lea.sflag [#allocation3], %s1267_s19 }
0x1625   : > { %p1699_p8 = pnand %p1705_p7, %p1989_p6 }
0x1627   : > { %1881 = dma.done.wait (!%p1699_p8), %s1268_s29, 32  }
0x1628   : > { %1883 = vsyncadd (!%p1699_p8), %s1268_s29, 4294967264  ;;  %s1277_s13 = scalar_lea.sflag [#allocation5], %s1267_s19 }
0x1629   : > { %1885 = dma.done.wait (!%p1699_p8), %s1277_s13, 32  }
0x162a   : > { %1887 = vsyncadd (!%p1699_p8), %s1277_s13, 4294967264  ;;  %p20_p5 = scmp.ge.s32.totalorder %s1972_s27, 4   ;;  %s2263_s21 = smov %s1894_s22 }
0x162b   : > { %s2264_s22 = smov %s1898_s23  ;;  %s2265_s23 = smov %s1983_s30 }
0x162c   : > { %s2266_s24 = smov %s1972_s27  ;;  %22 = sbr.rel (!%p20_p5) target bundleno = 5 (0x5), region = 125 }
0x1633   :  { %1282 = vsyncpa [#allocation3], 1 }
0x1634   :  { %1284 = vsyncpa [#allocation3 + $0x1], 1 }
0x1635   :  { %1285 = vsyncpa [#allocation5], 1 }
0x1636   :  { %1287 = vsyncpa [#allocation5 + $0x1], 1 }

</bundles_post_ra>
